<compile_context>
chip_gen: v7x
topology: tpu7x:2x2x1
jax: 0.10.0
libtpu: 0.0.40
codegen_flags: <defaults>
</compile_context>

<pallas_src>
import functools

import jax
import jax.numpy as jnp
from jax.experimental import pallas as pl
from jax.experimental.pallas import tpu as pltpu


def _round_up(x, m):
    return ((x + m - 1) // m) * m


def _cdiv(a, b):
    return (a + b - 1) // b


def _vmem_budget_bytes():
    """Generation-aware VMEM budget (leave headroom for Mosaic scratch)."""
    cap = 64 * 1024 * 1024                      # conservative default (v7x physical)
    try:
        cap = int(pltpu.get_tpu_info().vmem_capacity_bytes)
    except Exception:
        pass
    # ~75% of physical, capped at 100 MiB (v5e/v6e have 128 MiB physical).
    return max(16 * 1024 * 1024, min(cap * 3 // 4, 100 * 1024 * 1024))


def _choose_row_tile(n, tn_max):
    """Row tile: large (amortize ~0.35us/grid-step), multiple of 8, minimal
    padded-row waste, and >=2 tiles when there is enough work (v7x has 2 TCs)."""
    tn_max = max(8, (tn_max // 8) * 8)
    n8 = _round_up(n, 8)
    cands = [c for c in (1024, 512, 256, 128) if c <= tn_max]
    if not cands or n8 < cands[-1]:
        cands.append(min(n8, tn_max))
    if n8 >= 256:  # enough rows that megacore splitting matters
        two_tile = [c for c in cands if _cdiv(n, c) >= 2]
        cands = two_tile or cands

    def waste(c):
        return _cdiv(n, c) * c - n

    return min(cands, key=lambda c: (waste(c), -c))


def _resident_spec(shape, single_buffer):
    """Index-invariant operand: same block every grid step."""
    index_map = lambda i: (0, 0)
    if single_buffer:
        try:
            # A second buffer is pure waste for an operand whose block index
            # never changes (matters most on v7x's 64 MiB VMEM).
            return pl.BlockSpec(shape, index_map, pipeline_mode=pl.Buffered(1))
        except TypeError:  # older BlockSpec signature without pipeline_mode
            pass
    return pl.BlockSpec(shape, index_map)


def _mlp_kernel(num_layers, dims, x_ref, *refs):
    """(Linear+foldedBN -> ReLU) x (L-1) -> Linear, on one row tile.

    refs = (w_0, ..., w_{L-1}, shifts, out).  Matmul operands stay in the
    compute dtype; accumulation is f32; the accumulator is cast back to the
    compute dtype only between layers.
    """
    out_ref = refs[-1]
    shifts_ref = refs[-2]
    w_refs = refs[:num_layers]

    h = x_ref[...]
    for l in range(num_layers):
        d_out = dims[l + 1]
        acc = jnp.dot(h, w_refs[l][...], preferred_element_type=jnp.float32)
        acc = acc + shifts_ref[l:l + 1, 0:d_out]          # f32 bias (+BN shift)
        if l < num_layers - 1:
            acc = jnp.maximum(acc, 0.0)                   # ReLU
            h = acc.astype(w_refs[l + 1].dtype)           # back to MXU dtype
        else:
            out_ref[...] = acc.astype(out_ref.dtype)


def prepare_mlp_gad_nr_params(weights, biases, bn_gamma, bn_beta, bn_mean,
                              bn_var, *, eps=1e-5, compute_dtype=None):
    """Fold eval-mode BatchNorm1d + bias into the weights, once, outside the
    per-call hot path:

      BN(h @ W + b) = h @ (W * s) + (b * s + t),  s = gamma/sqrt(var+eps),
                                                  t = beta - mean * s.

    Returns (folded_weights, shifts_slab, dims).
    """
    num_layers = len(weights)
    if num_layers < 1:
        raise ValueError("number of layers should be positive!")
    if compute_dtype is None:
        compute_dtype = weights[0].dtype

    dims = [int(weights[0].shape[0])] + [int(w.shape[1]) for w in weights]
    max_d = max(dims[1:])

    folded_w = []
    shifts = jnp.zeros((num_layers, max_d), jnp.float32)
    for l in range(num_layers):
        w = weights[l].astype(jnp.float32)
        b = biases[l].astype(jnp.float32)
        if l < num_layers - 1:  # fold eval-mode BatchNorm1d
            s = bn_gamma[l].astype(jnp.float32) / jnp.sqrt(
                bn_var[l].astype(jnp.float32) + eps)
            t = bn_beta[l].astype(jnp.float32) - bn_mean[l].astype(jnp.float32) * s
            w = w * s[None, :]
            b = b * s + t
        folded_w.append(w.astype(compute_dtype))
        shifts = shifts.at[l, :dims[l + 1]].set(b)
    return folded_w, shifts, tuple(dims)


def mlp_gad_nr_forward(x, folded_weights, shifts, dims):
    """Fused Pallas forward.  `x` should already be in the compute dtype used
    by prepare_mlp_gad_nr_params (no hidden up-casts in the hot path)."""
    num_layers = len(folded_weights)
    n, in_dim = x.shape
    assert in_dim == dims[0]
    out_dim = dims[-1]
    out_dtype = x.dtype

    cbytes = jnp.dtype(folded_weights[0].dtype).itemsize
    xbytes = jnp.dtype(x.dtype).itemsize
    obytes = jnp.dtype(out_dtype).itemsize
    max_d = max(dims)

    vmem_budget = _vmem_budget_bytes()

    def resident_bytes(buf_count):
        wb = sum(int(w.size) * cbytes for w in folded_weights)
        sb = int(shifts.size) * 4
        return (wb + sb) * buf_count

    # Per-row VMEM: double-buffered x/out tiles + live f32 acc + compute-dtype h.
    per_row = 2 * in_dim * xbytes + 2 * out_dim * obytes + max_d * (4 + cbytes)
    headroom = 2 * 1024 * 1024                       # Mosaic internal scratch
    avail = vmem_budget - headroom - resident_bytes(2)   # worst-case buffering
    if avail < 8 * per_row:
        # TODO(synk): hidden dims too large for fully-resident weights; needs an
        # extra grid axis tiling the widest layer's K/N dims (not implemented).
        raise ValueError("MLP weights do not fit in VMEM for a resident-weight "
                         "kernel; add K/N tiling for this size.")
    tn = _choose_row_tile(n, avail // per_row)
    grid = (_cdiv(n, tn),)

    flops = 2 * n * sum(dims[l] * dims[l + 1] for l in range(num_layers))
    bytes_accessed = (n * in_dim * xbytes + n * out_dim * obytes
                      + resident_bytes(1))

    def run(single_buffer):
        in_specs = [pl.BlockSpec((tn, in_dim), lambda i: (i, 0))]
        in_specs += [_resident_spec(tuple(w.shape), single_buffer)
                     for w in folded_weights]
        in_specs += [_resident_spec(tuple(shifts.shape), single_buffer)]
        return pl.pallas_call(
            functools.partial(_mlp_kernel, num_layers, dims),
            out_shape=jax.ShapeDtypeStruct((n, out_dim), out_dtype),
            grid=grid,
            in_specs=in_specs,
            out_specs=pl.BlockSpec((tn, out_dim), lambda i: (i, 0)),
            compiler_params=pltpu.CompilerParams(
                dimension_semantics=("parallel",),     # megacore sharding (v7x)
                vmem_limit_bytes=int(vmem_budget),
            ),
            cost_estimate=pl.CostEstimate(
                flops=int(flops), transcendentals=0,
                bytes_accessed=int(bytes_accessed)),
        )(x, *folded_weights, shifts)

    try:
        out = run(single_buffer=True)
        out.block_until_ready()
        return out
    except Exception:
        # pl.Buffered(1) not supported by this jax/Mosaic version: fall back to
        # default (double-buffered) resident specs.
        return run(single_buffer=False)


if __name__ == "__main__":
    # Small shapes consistent with the module: n node embeddings -> 3-layer MLP.
    n, in_dim, hid_dim, out_dim, num_layers = 64, 32, 64, 48, 3
    eps = 1e-5

    key = jax.random.PRNGKey(0)
    kit = iter(jax.random.split(key, 1 + 2 * num_layers + 4 * (num_layers - 1)))

    x = jax.random.normal(next(kit), (n, in_dim), dtype=jnp.float32)

    layer_dims = [in_dim] + [hid_dim] * (num_layers - 1) + [out_dim]
    weights, biases = [], []
    for l in range(num_layers):
        di, do = layer_dims[l], layer_dims[l + 1]
        weights.append(
            jax.random.normal(next(kit), (di, do), jnp.float32) / float(di) ** 0.5)
        biases.append(0.1 * jax.random.normal(next(kit), (do,), jnp.float32))

    bn_gamma, bn_beta, bn_mean, bn_var = [], [], [], []
    for _ in range(num_layers - 1):
        bn_gamma.append(1.0 + 0.1 * jax.random.normal(next(kit), (hid_dim,), jnp.float32))
        bn_beta.append(0.1 * jax.random.normal(next(kit), (hid_dim,), jnp.float32))
        bn_mean.append(0.1 * jax.random.normal(next(kit), (hid_dim,), jnp.float32))
        bn_var.append(0.5 + jax.random.uniform(next(kit), (hid_dim,), jnp.float32))

    # Plain-JAX reference with identical (eval-mode BN) semantics.
    h = x.astype(jnp.float32)
    for l in range(num_layers - 1):
        h = jnp.dot(h, weights[l], precision=jax.lax.Precision.HIGHEST) + biases[l]
        h = (h - bn_mean[l]) / jnp.sqrt(bn_var[l] + eps) * bn_gamma[l] + bn_beta[l]
        h = jnp.maximum(h, 0.0)
    ref = jnp.dot(h, weights[-1], precision=jax.lax.Precision.HIGHEST) + biases[-1]

    # 1) float32 operands (matches the torch module's default dtype).
    fw, shifts, dims = prepare_mlp_gad_nr_params(
        weights, biases, bn_gamma, bn_beta, bn_mean, bn_var, eps=eps)
    out = jax.block_until_ready(mlp_gad_nr_forward(x, fw, shifts, dims))
    assert out.shape == (n, out_dim), out.shape
    err = float(jnp.max(jnp.abs(out - ref)))
    assert jnp.allclose(out, ref, atol=1e-3, rtol=1e-3), f"f32 max_err={err}"

    # 2) bf16 operands (MXU-native path: bf16 inputs, f32 accumulation).
    fw16, shifts16, dims16 = prepare_mlp_gad_nr_params(
        weights, biases, bn_gamma, bn_beta, bn_mean, bn_var, eps=eps,
        compute_dtype=jnp.bfloat16)
    out16 = jax.block_until_ready(
        mlp_gad_nr_forward(x.astype(jnp.bfloat16), fw16, shifts16, dims16))
    err16 = float(jnp.max(jnp.abs(out16.astype(jnp.float32) - ref)))
    assert err16 < 0.25, f"bf16 max_err={err16}"

    print("KERNEL_OK")
</pallas_src>

<mosaic_0001>
module attributes {stable_mosaic.version = 11 : i64} {
  func.func @_mlp_kernel(%arg0: i32, %arg1: memref<64x32xf32, #tpu.memory_space<vmem>>, %arg2: memref<32x64xf32, #tpu.memory_space<vmem>>, %arg3: memref<64x64xf32, #tpu.memory_space<vmem>>, %arg4: memref<64x48xf32, #tpu.memory_space<vmem>>, %arg5: memref<3x64xf32, #tpu.memory_space<vmem>>, %arg6: memref<64x48xf32, #tpu.memory_space<vmem>>) attributes {dimension_semantics = [#tpu.dimension_semantics<parallel>], iteration_bounds = array<i64: 1>, scalar_prefetch = 0 : i64, scratch_operands = 0 : i64, tpu.core_type = #tpu.core_type<tc>, window_params = [{transform_indices = @transform_0, window_bounds = array<i64: 64, 32>}, {pipeline_mode = #tpu.pipeline_mode<synchronous>, transform_indices = @transform_1, window_bounds = array<i64: 32, 64>}, {pipeline_mode = #tpu.pipeline_mode<synchronous>, transform_indices = @transform_2, window_bounds = array<i64: 64, 64>}, {pipeline_mode = #tpu.pipeline_mode<synchronous>, transform_indices = @transform_3, window_bounds = array<i64: 64, 48>}, {pipeline_mode = #tpu.pipeline_mode<synchronous>, transform_indices = @transform_4, window_bounds = array<i64: 3, 64>}, {transform_indices = @transform_5, window_bounds = array<i64: 64, 48>}]} {
    %c0 = arith.constant 0 : index
    %c0_0 = arith.constant 0 : index
    %0 = vector.load %arg1[%c0, %c0_0] : memref<64x32xf32, #tpu.memory_space<vmem>>, vector<64x32xf32>
    %c0_1 = arith.constant 0 : index
    %c0_2 = arith.constant 0 : index
    %1 = vector.load %arg2[%c0_1, %c0_2] : memref<32x64xf32, #tpu.memory_space<vmem>>, vector<32x64xf32>
    %cst = arith.constant dense<0.000000e+00> : vector<64x64xf32>
    %2 = tpu.matmul %0, %1, %cst {dimension_numbers = #tpu.dot_dimension_numbers<[1], [0], [0], [1], [0, 0, 1, 1], [], []>} : vector<64x32xf32>, vector<32x64xf32>, vector<64x64xf32> -> vector<64x64xf32>
    %c0_3 = arith.constant 0 : index
    %c0_4 = arith.constant 0 : index
    %3 = vector.load %arg5[%c0_3, %c0_4] : memref<3x64xf32, #tpu.memory_space<vmem>>, vector<1x64xf32>
    %4 = vector.broadcast %3 : vector<1x64xf32> to vector<64x64xf32>
    %5 = arith.addf %2, %4 : vector<64x64xf32>
    %cst_5 = arith.constant 0.000000e+00 : f32
    %6 = vector.broadcast %cst_5 : f32 to vector<64x64xf32>
    %7 = arith.maximumf %5, %6 : vector<64x64xf32>
    %c0_6 = arith.constant 0 : index
    %c0_7 = arith.constant 0 : index
    %8 = vector.load %arg3[%c0_6, %c0_7] : memref<64x64xf32, #tpu.memory_space<vmem>>, vector<64x64xf32>
    %cst_8 = arith.constant dense<0.000000e+00> : vector<64x64xf32>
    %9 = tpu.matmul %7, %8, %cst_8 {dimension_numbers = #tpu.dot_dimension_numbers<[1], [0], [0], [1], [0, 0, 1, 1], [], []>} : vector<64x64xf32>, vector<64x64xf32>, vector<64x64xf32> -> vector<64x64xf32>
    %c1 = arith.constant 1 : index
    %c0_9 = arith.constant 0 : index
    %10 = vector.load %arg5[%c1, %c0_9] : memref<3x64xf32, #tpu.memory_space<vmem>>, vector<1x64xf32>
    %11 = vector.broadcast %10 : vector<1x64xf32> to vector<64x64xf32>
    %12 = arith.addf %9, %11 : vector<64x64xf32>
    %cst_10 = arith.constant 0.000000e+00 : f32
    %13 = vector.broadcast %cst_10 : f32 to vector<64x64xf32>
    %14 = arith.maximumf %12, %13 : vector<64x64xf32>
    %c0_11 = arith.constant 0 : index
    %c0_12 = arith.constant 0 : index
    %15 = vector.load %arg4[%c0_11, %c0_12] : memref<64x48xf32, #tpu.memory_space<vmem>>, vector<64x48xf32>
    %cst_13 = arith.constant dense<0.000000e+00> : vector<64x48xf32>
    %16 = tpu.matmul %14, %15, %cst_13 {dimension_numbers = #tpu.dot_dimension_numbers<[1], [0], [0], [1], [0, 0, 1, 1], [], []>} : vector<64x64xf32>, vector<64x48xf32>, vector<64x48xf32> -> vector<64x48xf32>
    %c2 = arith.constant 2 : index
    %c0_14 = arith.constant 0 : index
    %17 = vector.load %arg5[%c2, %c0_14] : memref<3x64xf32, #tpu.memory_space<vmem>>, vector<1x48xf32>
    %18 = vector.broadcast %17 : vector<1x48xf32> to vector<64x48xf32>
    %19 = arith.addf %16, %18 : vector<64x48xf32>
    %c0_15 = arith.constant 0 : index
    %c0_16 = arith.constant 0 : index
    %20 = vector.load %arg6[%c0_15, %c0_16] : memref<64x48xf32, #tpu.memory_space<vmem>>, vector<64x48xf32>
    tpu.vector_store %arg6[%c0_15, %c0_16], %19 {strides = array<i32>} : memref<64x48xf32, #tpu.memory_space<vmem>>, vector<64x48xf32>,
    return
  }
  func.func @transform_0(%arg0: i32) -> (i32, i32) {
    %c0_i32 = arith.constant 0 : i32
    %c0_i32_0 = arith.constant 0 : i32
    return %arg0, %c0_i32 : i32, i32
  }
  func.func @transform_1(%arg0: i32) -> (i32, i32) {
    %c0_i32 = arith.constant 0 : i32
    %c0_i32_0 = arith.constant 0 : i32
    %c0_i32_1 = arith.constant 0 : i32
    return %c0_i32, %c0_i32_0 : i32, i32
  }
  func.func @transform_2(%arg0: i32) -> (i32, i32) {
    %c0_i32 = arith.constant 0 : i32
    %c0_i32_0 = arith.constant 0 : i32
    %c0_i32_1 = arith.constant 0 : i32
    return %c0_i32, %c0_i32_0 : i32, i32
  }
  func.func @transform_3(%arg0: i32) -> (i32, i32) {
    %c0_i32 = arith.constant 0 : i32
    %c0_i32_0 = arith.constant 0 : i32
    %c0_i32_1 = arith.constant 0 : i32
    return %c0_i32, %c0_i32_0 : i32, i32
  }
  func.func @transform_4(%arg0: i32) -> (i32, i32) {
    %c0_i32 = arith.constant 0 : i32
    %c0_i32_0 = arith.constant 0 : i32
    %c0_i32_1 = arith.constant 0 : i32
    return %c0_i32, %c0_i32_0 : i32, i32
  }
  func.func @transform_5(%arg0: i32) -> (i32, i32) {
    %c0_i32 = arith.constant 0 : i32
    %c0_i32_0 = arith.constant 0 : i32
    return %arg0, %c0_i32 : i32, i32
  }
}

module attributes {stable_mosaic.version = 11 : i64} {
  func.func @_mlp_kernel(%arg0: i32, %arg1: memref<64x32xf32, #tpu.memory_space<vmem>>, %arg2: memref<32x64xf32, #tpu.memory_space<vmem>>, %arg3: memref<64x64xf32, #tpu.memory_space<vmem>>, %arg4: memref<64x48xf32, #tpu.memory_space<vmem>>, %arg5: memref<3x64xf32, #tpu.memory_space<vmem>>, %arg6: memref<64x48xf32, #tpu.memory_space<vmem>>) attributes {dimension_semantics = [#tpu.dimension_semantics<parallel>], iteration_bounds = array<i64: 1>, scalar_prefetch = 0 : i64, scratch_operands = 0 : i64, tpu.core_type = #tpu.core_type<tc>, window_params = [{transform_indices = @transform_0, window_bounds = array<i64: 64, 32>}, {pipeline_mode = #tpu.pipeline_mode<synchronous>, transform_indices = @transform_1, window_bounds = array<i64: 32, 64>}, {pipeline_mode = #tpu.pipeline_mode<synchronous>, transform_indices = @transform_2, window_bounds = array<i64: 64, 64>}, {pipeline_mode = #tpu.pipeline_mode<synchronous>, transform_indices = @transform_3, window_bounds = array<i64: 64, 48>}, {pipeline_mode = #tpu.pipeline_mode<synchronous>, transform_indices = @transform_4, window_bounds = array<i64: 3, 64>}, {transform_indices = @transform_5, window_bounds = array<i64: 64, 48>}]} {
    %c0 = arith.constant 0 : index
    %c0_0 = arith.constant 0 : index
    %0 = vector.load %arg1[%c0, %c0_0] : memref<64x32xf32, #tpu.memory_space<vmem>>, vector<64x32xf32>
    %c0_1 = arith.constant 0 : index
    %c0_2 = arith.constant 0 : index
    %1 = vector.load %arg2[%c0_1, %c0_2] : memref<32x64xf32, #tpu.memory_space<vmem>>, vector<32x64xf32>
    %cst = arith.constant dense<0.000000e+00> : vector<64x64xf32>
    %2 = tpu.matmul %0, %1, %cst {dimension_numbers = #tpu.dot_dimension_numbers<[1], [0], [0], [1], [0, 0, 1, 1], [], []>} : vector<64x32xf32>, vector<32x64xf32>, vector<64x64xf32> -> vector<64x64xf32>
    %c0_3 = arith.constant 0 : index
    %c0_4 = arith.constant 0 : index
    %3 = vector.load %arg5[%c0_3, %c0_4] : memref<3x64xf32, #tpu.memory_space<vmem>>, vector<1x64xf32>
    %4 = vector.broadcast %3 : vector<1x64xf32> to vector<64x64xf32>
    %5 = arith.addf %2, %4 : vector<64x64xf32>
    %cst_5 = arith.constant 0.000000e+00 : f32
    %6 = vector.broadcast %cst_5 : f32 to vector<64x64xf32>
    %7 = arith.maximumf %5, %6 : vector<64x64xf32>
    %c0_6 = arith.constant 0 : index
    %c0_7 = arith.constant 0 : index
    %8 = vector.load %arg3[%c0_6, %c0_7] : memref<64x64xf32, #tpu.memory_space<vmem>>, vector<64x64xf32>
    %cst_8 = arith.constant dense<0.000000e+00> : vector<64x64xf32>
    %9 = tpu.matmul %7, %8, %cst_8 {dimension_numbers = #tpu.dot_dimension_numbers<[1], [0], [0], [1], [0, 0, 1, 1], [], []>} : vector<64x64xf32>, vector<64x64xf32>, vector<64x64xf32> -> vector<64x64xf32>
    %c1 = arith.constant 1 : index
    %c0_9 = arith.constant 0 : index
    %10 = vector.load %arg5[%c1, %c0_9] : memref<3x64xf32, #tpu.memory_space<vmem>>, vector<1x64xf32>
    %11 = vector.broadcast %10 : vector<1x64xf32> to vector<64x64xf32>
    %12 = arith.addf %9, %11 : vector<64x64xf32>
    %cst_10 = arith.constant 0.000000e+00 : f32
    %13 = vector.broadcast %cst_10 : f32 to vector<64x64xf32>
    %14 = arith.maximumf %12, %13 : vector<64x64xf32>
    %c0_11 = arith.constant 0 : index
    %c0_12 = arith.constant 0 : index
    %15 = vector.load %arg4[%c0_11, %c0_12] : memref<64x48xf32, #tpu.memory_space<vmem>>, vector<64x48xf32>
    %cst_13 = arith.constant dense<0.000000e+00> : vector<64x48xf32>
    %16 = tpu.matmul %14, %15, %cst_13 {dimension_numbers = #tpu.dot_dimension_numbers<[1], [0], [0], [1], [0, 0, 1, 1], [], []>} : vector<64x64xf32>, vector<64x48xf32>, vector<64x48xf32> -> vector<64x48xf32>
    %c2 = arith.constant 2 : index
    %c0_14 = arith.constant 0 : index
    %17 = vector.load %arg5[%c2, %c0_14] : memref<3x64xf32, #tpu.memory_space<vmem>>, vector<1x48xf32>
    %18 = vector.broadcast %17 : vector<1x48xf32> to vector<64x48xf32>
    %19 = arith.addf %16, %18 : vector<64x48xf32>
    %c0_15 = arith.constant 0 : index
    %c0_16 = arith.constant 0 : index
    %20 = vector.load %arg6[%c0_15, %c0_16] : memref<64x48xf32, #tpu.memory_space<vmem>>, vector<64x48xf32>
    tpu.vector_store %arg6[%c0_15, %c0_16], %19 {strides = array<i32>} : memref<64x48xf32, #tpu.memory_space<vmem>>, vector<64x48xf32>,
    return
  }
  func.func @transform_0(%arg0: i32) -> (i32, i32) {
    %c0_i32 = arith.constant 0 : i32
    %c0_i32_0 = arith.constant 0 : i32
    return %arg0, %c0_i32 : i32, i32
  }
  func.func @transform_1(%arg0: i32) -> (i32, i32) {
    %c0_i32 = arith.constant 0 : i32
    %c0_i32_0 = arith.constant 0 : i32
    %c0_i32_1 = arith.constant 0 : i32
    return %c0_i32, %c0_i32_0 : i32, i32
  }
  func.func @transform_2(%arg0: i32) -> (i32, i32) {
    %c0_i32 = arith.constant 0 : i32
    %c0_i32_0 = arith.constant 0 : i32
    %c0_i32_1 = arith.constant 0 : i32
    return %c0_i32, %c0_i32_0 : i32, i32
  }
  func.func @transform_3(%arg0: i32) -> (i32, i32) {
    %c0_i32 = arith.constant 0 : i32
    %c0_i32_0 = arith.constant 0 : i32
    %c0_i32_1 = arith.constant 0 : i32
    return %c0_i32, %c0_i32_0 : i32, i32
  }
  func.func @transform_4(%arg0: i32) -> (i32, i32) {
    %c0_i32 = arith.constant 0 : i32
    %c0_i32_0 = arith.constant 0 : i32
    %c0_i32_1 = arith.constant 0 : i32
    return %c0_i32, %c0_i32_0 : i32, i32
  }
  func.func @transform_5(%arg0: i32) -> (i32, i32) {
    %c0_i32 = arith.constant 0 : i32
    %c0_i32_0 = arith.constant 0 : i32
    return %arg0, %c0_i32 : i32, i32
  }
}

</mosaic_0001>

<bundles_post_ra>
// kernel: tpu_custom_call.1
= control target key start
LH: loop header
LB: loop body
LE: loop exit
PB: predicated region body
PF: predicated region fallthrough
CT: control target
= control target key end

     0   :  { %vm37_vm0 = vcmask 261120   ;;  %vm188_vm1 = vcmask 523264   ;;  %vm468_vm2 = vcmask 392192   ;;  %s855_s1 = inlined_call_operand.vmem [shape: f32[32,64], index: 1, kind: input, shape index: {}]   ;;  %s856_s0 = inlined_call_operand.vmem [shape: f32[64,32], index: 0, kind: input, shape index: {}]   ;;  %s857_s2 = inlined_call_operand.vmem [shape: f32[64,64], index: 2, kind: input, shape index: {}]   ;;  %s858_s3 = inlined_call_operand.vmem [shape: f32[64,48], index: 3, kind: input, shape index: {}]   ;;  %s859_s4 = inlined_call_operand.vmem [shape: f32[3,64], index: 4, kind: input, shape index: {}]   ;;  %s860_s5 = inlined_call_operand.vmem [shape: f32[64,48], index: 5, kind: output, shape index: {}]  }
   0x1   :  { %v28_v0 = vld [vmem:[%s855_s1] sm:$0xff]  ;;  %v29_v1 = vld [vmem:[%s855_s1 + $0x8] sm:$0xff]  ;;  %v30_v2 = vld [vmem:[%s855_s1 + $0x10] sm:$0xff] }
   0x2   :  { %v628_v3 = vpack.c.bf16 %v29_v1, %v28_v0  ;;  %v31_v4 = vld [vmem:[%s855_s1 + $0x18] sm:$0xff]  ;;  %v20_v5 = vld [vmem:[%s856_s0] sm:$0xff]  ;;  %v176_v8 = vld [vmem:[%s857_s2 + $0x8] sm:$0xff] }
   0x3   :  { %v632_v6 = vpack.c.bf16 %v31_v4, %v30_v2  ;;  %560 = vmatprep.mubr.msk.f32.mxu0 %vm37_vm0, %v20_v5  ;;  %v175_v7 = vld [vmem:[%s857_s2] sm:$0xff]  ;;  %v177_v9 = vld [vmem:[%s857_s2 + $0x10] sm:$0xff]  ;;  %v178_v11 = vld [vmem:[%s857_s2 + $0x18] sm:$0xff] }
   0x4   :  { %629 = vmatprep.subr.bf16.mxu0 %v628_v3  ;;  %v636_v10 = vpack.c.bf16 %v176_v8, %v175_v7  ;;  %v640_v12 = vpack.c.bf16 %v178_v11, %v177_v9  ;;  %v179_v13 = vld [vmem:[%s857_s2 + $0x20] sm:$0xff]  ;;  %v180_v14 = vld [vmem:[%s857_s2 + $0x28] sm:$0xff]  ;;  %v22_v16 = vld [vmem:[%s856_s0 + $0x10] sm:$0xff] }
   0x5   :  { %631 = vmatpush3.bf16.msra.mxu0 %v628_v3  ;;  %v21_v15 = vld [vmem:[%s856_s0 + $0x8] sm:$0xff]  ;;  %v644_v17 = vpack.c.bf16 %v180_v14, %v179_v13  ;;  %v23_v18 = vld [vmem:[%s856_s0 + $0x18] sm:$0xff]  ;;  %v24_v19 = vld [vmem:[%s856_s0 + $0x20] sm:$0xff] }
   0x6   :  { %633 = vmatprep.subr.bf16.mxu0 %v632_v6  ;;  %637 = vmatprep.subr.bf16.mxu1 %v636_v10  ;;  %v25_v20 = vld [vmem:[%s856_s0 + $0x28] sm:$0xff]  ;;  %v26_v21 = vld [vmem:[%s856_s0 + $0x30] sm:$0xff]  ;;  %v27_v22 = vld [vmem:[%s856_s0 + $0x38] sm:$0xff] }
   0x7   :  { %639 = vmatpush3.bf16.msra.mxu1 %v636_v10  ;;  %v181_v23 = vld [vmem:[%s857_s2 + $0x30] sm:$0xff]  ;;  %v182_v24 = vld [vmem:[%s857_s2 + $0x38] sm:$0xff]  ;;  %v326_v26 = vld [vmem:[%s858_s3] sm:$0xff] }
   0x8   :  { %641 = vmatprep.subr.bf16.mxu1 %v640_v12  ;;  %v648_v25 = vpack.c.bf16 %v182_v24, %v181_v23  ;;  %v327_v27 = vld [vmem:[%s858_s3 + $0x8] sm:$0xff]  ;;  %v328_v28 = vld [vmem:[%s858_s3 + $0x10] sm:$0xff]  ;;  %v329_v30 = vld [vmem:[%s858_s3 + $0x18] sm:$0xff] }
   0x9   :  { %635 = vmatpush3.bf16.msra.mxu0 %v632_v6  ;;  %v652_v29 = vpack.c.bf16 %v327_v27, %v326_v26  ;;  %v656_v31 = vpack.c.bf16 %v329_v30, %v328_v28  ;;  %v330_v32 = vld [vmem:[%s858_s3 + $0x20] sm:$0xff]  ;;  %v331_v33 = vld [vmem:[%s858_s3 + $0x28] sm:$0xff]  ;;  %v332_v60 = vld [vmem:[%s858_s3 + $0x30] sm:$0xff] }
   0xa   :  { %v660_v34 = vpack.c.bf16 %v331_v33, %v330_v32  ;;  %v481_v35 = vld [vmem:[%s859_s4] ss:$0 sm:$0xff]  ;;  %v333_v61 = vld [vmem:[%s858_s3 + $0x38] sm:$0xff]  ;;  %v490_v63 = vld [vmem:[%s859_s4 + $0x1] ss:$0 sm:$0xff] }
   0xb   :  { %643 = vmatpush3.bf16.msra.mxu1 %v640_v12  ;;  %653 = vmatprep.subr.bf16.mxu0 %v652_v29  ;;  %v664_v62 = vpack.c.bf16 %v333_v61, %v332_v60  ;;  %v499_v24 = vld [vmem:[%s859_s4 + $0x2] ss:$0 sm:$0xff] }
   0xc   :  { %561 = vmatmul.mubr.msk.f32.vlgmr.msra.gmra.mrb[0].mxu0 %vm37_vm0, %v21_v15  ;;  %645 = vmatprep.subr.bf16.mxu1 %v644_v17 }
   0xd   :  { %563 = vmatprep.mubr.msk.f32.mxu0 %vm37_vm0, %v22_v16  ;;  %655 = vmatpush3.bf16.msra.mxu0 %v652_v29 }
   0xe   :  { %657 = vmatprep.subr.bf16.mxu0 %v656_v31 }
   0xf   :  { %647 = vmatpush3.bf16.msra.mxu1 %v644_v17 }
  0x10   :  { %564 = vmatmul.mubr.msk.f32.gmra.mrb[2].mxu0 %vm37_vm0, %v23_v18  ;;  %649 = vmatprep.subr.bf16.mxu1 %v648_v25 }
  0x11   :  { %566 = vmatprep.mubr.msk.f32.mxu0 %vm37_vm0, %v24_v19  ;;  %659 = vmatpush3.bf16.msra.mxu0 %v656_v31 }
  0x12   :  { %661 = vmatprep.subr.bf16.mxu0 %v660_v34 }
  0x13   :  { %651 = vmatpush3.bf16.msra.mxu1 %v648_v25 }
  0x14   :  { %567 = vmatmul.mubr.msk.f32.gmra.mrb[4].mxu0 %vm37_vm0, %v25_v20  ;;  %668 = vmatprep.subr.bf16.mxu1 %v652_v29 }
  0x15   :  { %569 = vmatprep.mubr.msk.f32.mxu0 %vm37_vm0, %v26_v21  ;;  %663 = vmatpush3.bf16.msra.mxu0 %v660_v34 }
  0x16   :  { %665 = vmatprep.subr.bf16.mxu0 %v664_v62 }
  0x18   :  { %570 = vmatmul.mubr.msk.f32.gmra.mrb[6].mxu0 %vm37_vm0, %v27_v22 }
  0x19   :  { %667 = vmatpush3.bf16.msra.mxu0 %v664_v62 }
  0xdf   :  { %v562_v36 = vpop.f32.mrb[0].mxu0 }
  0xe0   :  { %v134_v37 = vadd.f32 %v562_v36, %v481_v35  ;;  %v128_v38 = vpop.f32.mrb[1].mxu0 }
  0xe1   :  { %v129_v39 = vadd.f32 %v481_v35, %v128_v38 }
  0xe2   :  { %v168_v42 = vmax.f32 %v134_v37, 0.0 }
  0xe3   :  { %v167_v40 = vmax.f32 %v129_v39, 0.0  ;;  %v565_v41 = vpop.f32.mrb[2].mxu0 }
  0xe4   :  { %v144_v43 = vadd.f32 %v565_v41, %v481_v35  ;;  %v138_v44 = vpop.f32.mrb[3].mxu0 }
  0xe5   :  { %v139_v45 = vadd.f32 %v481_v35, %v138_v44  ;;  %588 = vmatprep.mubr.msk.f32.mxu1 %vm188_vm1, %v167_v40 }
  0xe6   :  { %589 = vmatmul.mubr.msk.f32.vlgmr.msra.gmra.mrb[0].mxu1 %vm188_vm1, %v168_v42  ;;  %v170_v48 = vmax.f32 %v144_v43, 0.0 }
  0xe7   :  { %v169_v46 = vmax.f32 %v139_v45, 0.0  ;;  %v568_v47 = vpop.f32.mrb[4].mxu0  ;;  %672 = vmatpush3.bf16.msra.mxu1 %v652_v29 }
  0xe8   :  { %v154_v49 = vadd.f32 %v568_v47, %v481_v35  ;;  %v148_v50 = vpop.f32.mrb[5].mxu0  ;;  %669 = vmatprep.subr.bf16.mxu1 %v656_v31 }
  0xe9   :  { %v149_v51 = vadd.f32 %v481_v35, %v148_v50  ;;  %591 = vmatprep.mubr.msk.f32.mxu1 %vm188_vm1, %v169_v46 }
  0xea   :  { %592 = vmatmul.mubr.msk.f32.gmra.mrb[2].mxu1 %vm188_vm1, %v170_v48  ;;  %v172_v54 = vmax.f32 %v154_v49, 0.0 }
  0xeb   :  { %v171_v52 = vmax.f32 %v149_v51, 0.0  ;;  %v571_v53 = vpop.f32.mrb[6].mxu0  ;;  %673 = vmatpush3.bf16.msra.mxu1 %v656_v31 }
  0xec   :  { %v164_v55 = vadd.f32 %v571_v53, %v481_v35  ;;  %v158_v56 = vpop.f32.mrb[7].mxu0  ;;  %670 = vmatprep.subr.bf16.mxu1 %v660_v34 }
  0xed   :  { %v159_v57 = vadd.f32 %v481_v35, %v158_v56  ;;  %594 = vmatprep.mubr.msk.f32.mxu1 %vm188_vm1, %v171_v52 }
  0xee   :  { %595 = vmatmul.mubr.msk.f32.gmra.mrb[4].mxu1 %vm188_vm1, %v172_v54  ;;  %v174_v59 = vmax.f32 %v164_v55, 0.0 }
  0xef   :  { %v173_v58 = vmax.f32 %v159_v57, 0.0  ;;  %674 = vmatpush3.bf16.msra.mxu1 %v660_v34 }
  0xf0   :  { %671 = vmatprep.subr.bf16.mxu1 %v664_v62 }
  0xf1   :  { %597 = vmatprep.mubr.msk.f32.mxu1 %vm188_vm1, %v173_v58 }
  0xf2   :  { %598 = vmatmul.mubr.msk.f32.gmra.mrb[6].mxu1 %vm188_vm1, %v174_v59 }
  0xf3   :  { %675 = vmatpush3.bf16.msra.mxu1 %v664_v62 }
 0x1b9   :  { %v590_v0 = vpop.f32.mrb[0].mxu1 }
 0x1ba   :  { %v285_v1 = vadd.f32 %v590_v0, %v490_v63  ;;  %v279_v2 = vpop.f32.mrb[1].mxu1 }
 0x1bb   :  { %v280_v3 = vadd.f32 %v490_v63, %v279_v2 }
 0x1bc   :  { %v319_v6 = vmax.f32 %v285_v1, 0.0 }
 0x1bd   :  { %v318_v4 = vmax.f32 %v280_v3, 0.0  ;;  %v593_v5 = vpop.f32.mrb[2].mxu1 }
 0x1be   :  { %v295_v7 = vadd.f32 %v593_v5, %v490_v63  ;;  %v289_v8 = vpop.f32.mrb[3].mxu1 }
 0x1bf   :  { %v290_v9 = vadd.f32 %v490_v63, %v289_v8  ;;  %616 = vmatprep.mubr.msk.f32.mxu0 %vm188_vm1, %v318_v4 }
 0x1c0   :  { %617 = vmatmul.mubr.msk.f32.vlgmr.msra.gmra.mrb[8].mxu0 %vm188_vm1, %v319_v6  ;;  %v321_v12 = vmax.f32 %v295_v7, 0.0 }
 0x1c1   :  { %v320_v10 = vmax.f32 %v290_v9, 0.0  ;;  %v596_v11 = vpop.f32.mrb[4].mxu1 }
 0x1c2   :  { %v305_v13 = vadd.f32 %v596_v11, %v490_v63  ;;  %v299_v14 = vpop.f32.mrb[5].mxu1 }
 0x1c3   :  { %v300_v15 = vadd.f32 %v490_v63, %v299_v14  ;;  %619 = vmatprep.mubr.msk.f32.mxu0 %vm188_vm1, %v320_v10 }
 0x1c4   :  { %620 = vmatmul.mubr.msk.f32.gmra.mrb[10].mxu0 %vm188_vm1, %v321_v12  ;;  %v323_v18 = vmax.f32 %v305_v13, 0.0 }
 0x1c5   :  { %v322_v16 = vmax.f32 %v300_v15, 0.0  ;;  %v599_v17 = vpop.f32.mrb[6].mxu1 }
 0x1c6   :  { %v315_v19 = vadd.f32 %v599_v17, %v490_v63  ;;  %v309_v20 = vpop.f32.mrb[7].mxu1 }
 0x1c7   :  { %v310_v21 = vadd.f32 %v490_v63, %v309_v20  ;;  %622 = vmatprep.mubr.msk.f32.mxu0 %vm188_vm1, %v322_v16 }
 0x1c8   :  { %623 = vmatmul.mubr.msk.f32.gmra.mrb[12].mxu0 %vm188_vm1, %v323_v18  ;;  %v325_v23 = vmax.f32 %v315_v19, 0.0 }
 0x1c9   :  { %v324_v22 = vmax.f32 %v310_v21, 0.0 }
 0x1cb   :  { %625 = vmatprep.mubr.msk.f32.mxu1 %vm188_vm1, %v324_v22 }
 0x1cc   :  { %626 = vmatmul.mubr.msk.f32.vlgmr.msra.gmra.mrb[8].mxu1 %vm188_vm1, %v325_v23 }
 0x293   :  { %v618_v25 = vpop.f32.mrb[8].mxu0 }
 0x294   :  { %v435_v26 = vadd.f32 %v618_v25, %v499_v24  ;;  %v429_v27 = vpop.f32.mrb[9].mxu0 }
 0x295   :  { %v430_v28 = vadd.f32 %v499_v24, %v429_v27 }
 0x296   :  { %470 = vst.msk [vmem:[%s860_s5 + $0x8] sm:$0xff] %vm468_vm2, %v435_v26 }
 0x297   :  { %469 = vst.msk [vmem:[%s860_s5] sm:$0xff] %vm468_vm2, %v430_v28  ;;  %v621_v29 = vpop.f32.mrb[10].mxu0 }
 0x298   :  { %v445_v30 = vadd.f32 %v621_v29, %v499_v24  ;;  %v439_v31 = vpop.f32.mrb[11].mxu0 }
 0x299   :  { %v440_v32 = vadd.f32 %v499_v24, %v439_v31 }
 0x29a   :  { %472 = vst.msk [vmem:[%s860_s5 + $0x18] sm:$0xff] %vm468_vm2, %v445_v30 }
 0x29b   :  { %471 = vst.msk [vmem:[%s860_s5 + $0x10] sm:$0xff] %vm468_vm2, %v440_v32  ;;  %v624_v33 = vpop.f32.mrb[12].mxu0 }
 0x29c   :  { %v455_v34 = vadd.f32 %v624_v33, %v499_v24  ;;  %v449_v35 = vpop.f32.mrb[13].mxu0 }
 0x29d   :  { %v450_v36 = vadd.f32 %v499_v24, %v449_v35 }
 0x29e   :  { %474 = vst.msk [vmem:[%s860_s5 + $0x28] sm:$0xff] %vm468_vm2, %v455_v34 }
 0x29f   :  { %473 = vst.msk [vmem:[%s860_s5 + $0x20] sm:$0xff] %vm468_vm2, %v450_v36  ;;  %v627_v37 = vpop.f32.mrb[8].mxu1 }
 0x2a0   :  { %v465_v38 = vadd.f32 %v627_v37, %v499_v24  ;;  %v459_v39 = vpop.f32.mrb[9].mxu1 }
 0x2a1   :  { %v460_v40 = vadd.f32 %v499_v24, %v459_v39 }
 0x2a2   :  { %476 = vst.msk [vmem:[%s860_s5 + $0x38] sm:$0xff] %vm468_vm2, %v465_v38 }
 0x2a3   :  { %475 = vst.msk [vmem:[%s860_s5 + $0x30] sm:$0xff] %vm468_vm2, %v460_v40 }

// kernel: tpu_custom_call.1
= control target key start
LH: loop header
LB: loop body
LE: loop exit
PB: predicated region body
PF: predicated region fallthrough
CT: control target
= control target key end

     0   :  { %vm37_vm0 = vcmask 261120   ;;  %vm188_vm1 = vcmask 523264   ;;  %vm468_vm2 = vcmask 392192   ;;  %s855_s1 = inlined_call_operand.vmem [shape: f32[32,64], index: 1, kind: input, shape index: {}]   ;;  %s856_s0 = inlined_call_operand.vmem [shape: f32[64,32], index: 0, kind: input, shape index: {}]   ;;  %s857_s2 = inlined_call_operand.vmem [shape: f32[64,64], index: 2, kind: input, shape index: {}]   ;;  %s858_s3 = inlined_call_operand.vmem [shape: f32[64,48], index: 3, kind: input, shape index: {}]   ;;  %s859_s4 = inlined_call_operand.vmem [shape: f32[3,64], index: 4, kind: input, shape index: {}]   ;;  %s860_s5 = inlined_call_operand.vmem [shape: f32[64,48], index: 5, kind: output, shape index: {}]  }
   0x1   :  { %v28_v0 = vld [vmem:[%s855_s1] sm:$0xff]  ;;  %v29_v1 = vld [vmem:[%s855_s1 + $0x8] sm:$0xff]  ;;  %v30_v2 = vld [vmem:[%s855_s1 + $0x10] sm:$0xff] }
   0x2   :  { %v628_v3 = vpack.c.bf16 %v29_v1, %v28_v0  ;;  %v31_v4 = vld [vmem:[%s855_s1 + $0x18] sm:$0xff]  ;;  %v20_v5 = vld [vmem:[%s856_s0] sm:$0xff]  ;;  %v176_v8 = vld [vmem:[%s857_s2 + $0x8] sm:$0xff] }
   0x3   :  { %v632_v6 = vpack.c.bf16 %v31_v4, %v30_v2  ;;  %560 = vmatprep.mubr.msk.f32.mxu0 %vm37_vm0, %v20_v5  ;;  %v175_v7 = vld [vmem:[%s857_s2] sm:$0xff]  ;;  %v177_v9 = vld [vmem:[%s857_s2 + $0x10] sm:$0xff]  ;;  %v178_v11 = vld [vmem:[%s857_s2 + $0x18] sm:$0xff] }
   0x4   :  { %629 = vmatprep.subr.bf16.mxu0 %v628_v3  ;;  %v636_v10 = vpack.c.bf16 %v176_v8, %v175_v7  ;;  %v640_v12 = vpack.c.bf16 %v178_v11, %v177_v9  ;;  %v179_v13 = vld [vmem:[%s857_s2 + $0x20] sm:$0xff]  ;;  %v180_v14 = vld [vmem:[%s857_s2 + $0x28] sm:$0xff]  ;;  %v22_v16 = vld [vmem:[%s856_s0 + $0x10] sm:$0xff] }
   0x5   :  { %631 = vmatpush3.bf16.msra.mxu0 %v628_v3  ;;  %v21_v15 = vld [vmem:[%s856_s0 + $0x8] sm:$0xff]  ;;  %v644_v17 = vpack.c.bf16 %v180_v14, %v179_v13  ;;  %v23_v18 = vld [vmem:[%s856_s0 + $0x18] sm:$0xff]  ;;  %v24_v19 = vld [vmem:[%s856_s0 + $0x20] sm:$0xff] }
   0x6   :  { %633 = vmatprep.subr.bf16.mxu0 %v632_v6  ;;  %637 = vmatprep.subr.bf16.mxu1 %v636_v10  ;;  %v25_v20 = vld [vmem:[%s856_s0 + $0x28] sm:$0xff]  ;;  %v26_v21 = vld [vmem:[%s856_s0 + $0x30] sm:$0xff]  ;;  %v27_v22 = vld [vmem:[%s856_s0 + $0x38] sm:$0xff] }
   0x7   :  { %639 = vmatpush3.bf16.msra.mxu1 %v636_v10  ;;  %v181_v23 = vld [vmem:[%s857_s2 + $0x30] sm:$0xff]  ;;  %v182_v24 = vld [vmem:[%s857_s2 + $0x38] sm:$0xff]  ;;  %v326_v26 = vld [vmem:[%s858_s3] sm:$0xff] }
   0x8   :  { %641 = vmatprep.subr.bf16.mxu1 %v640_v12  ;;  %v648_v25 = vpack.c.bf16 %v182_v24, %v181_v23  ;;  %v327_v27 = vld [vmem:[%s858_s3 + $0x8] sm:$0xff]  ;;  %v328_v28 = vld [vmem:[%s858_s3 + $0x10] sm:$0xff]  ;;  %v329_v30 = vld [vmem:[%s858_s3 + $0x18] sm:$0xff] }
   0x9   :  { %635 = vmatpush3.bf16.msra.mxu0 %v632_v6  ;;  %v652_v29 = vpack.c.bf16 %v327_v27, %v326_v26  ;;  %v656_v31 = vpack.c.bf16 %v329_v30, %v328_v28  ;;  %v330_v32 = vld [vmem:[%s858_s3 + $0x20] sm:$0xff]  ;;  %v331_v33 = vld [vmem:[%s858_s3 + $0x28] sm:$0xff]  ;;  %v332_v60 = vld [vmem:[%s858_s3 + $0x30] sm:$0xff] }
   0xa   :  { %v660_v34 = vpack.c.bf16 %v331_v33, %v330_v32  ;;  %v481_v35 = vld [vmem:[%s859_s4] ss:$0 sm:$0xff]  ;;  %v333_v61 = vld [vmem:[%s858_s3 + $0x38] sm:$0xff]  ;;  %v490_v63 = vld [vmem:[%s859_s4 + $0x1] ss:$0 sm:$0xff] }
   0xb   :  { %643 = vmatpush3.bf16.msra.mxu1 %v640_v12  ;;  %653 = vmatprep.subr.bf16.mxu0 %v652_v29  ;;  %v664_v62 = vpack.c.bf16 %v333_v61, %v332_v60  ;;  %v499_v24 = vld [vmem:[%s859_s4 + $0x2] ss:$0 sm:$0xff] }
   0xc   :  { %561 = vmatmul.mubr.msk.f32.vlgmr.msra.gmra.mrb[0].mxu0 %vm37_vm0, %v21_v15  ;;  %645 = vmatprep.subr.bf16.mxu1 %v644_v17 }
   0xd   :  { %563 = vmatprep.mubr.msk.f32.mxu0 %vm37_vm0, %v22_v16  ;;  %655 = vmatpush3.bf16.msra.mxu0 %v652_v29 }
   0xe   :  { %657 = vmatprep.subr.bf16.mxu0 %v656_v31 }
   0xf   :  { %647 = vmatpush3.bf16.msra.mxu1 %v644_v17 }
  0x10   :  { %564 = vmatmul.mubr.msk.f32.gmra.mrb[2].mxu0 %vm37_vm0, %v23_v18  ;;  %649 = vmatprep.subr.bf16.mxu1 %v648_v25 }
  0x11   :  { %566 = vmatprep.mubr.msk.f32.mxu0 %vm37_vm0, %v24_v19  ;;  %659 = vmatpush3.bf16.msra.mxu0 %v656_v31 }
  0x12   :  { %661 = vmatprep.subr.bf16.mxu0 %v660_v34 }
  0x13   :  { %651 = vmatpush3.bf16.msra.mxu1 %v648_v25 }
  0x14   :  { %567 = vmatmul.mubr.msk.f32.gmra.mrb[4].mxu0 %vm37_vm0, %v25_v20  ;;  %668 = vmatprep.subr.bf16.mxu1 %v652_v29 }
  0x15   :  { %569 = vmatprep.mubr.msk.f32.mxu0 %vm37_vm0, %v26_v21  ;;  %663 = vmatpush3.bf16.msra.mxu0 %v660_v34 }
  0x16   :  { %665 = vmatprep.subr.bf16.mxu0 %v664_v62 }
  0x18   :  { %570 = vmatmul.mubr.msk.f32.gmra.mrb[6].mxu0 %vm37_vm0, %v27_v22 }
  0x19   :  { %667 = vmatpush3.bf16.msra.mxu0 %v664_v62 }
  0xdf   :  { %v562_v36 = vpop.f32.mrb[0].mxu0 }
  0xe0   :  { %v134_v37 = vadd.f32 %v562_v36, %v481_v35  ;;  %v128_v38 = vpop.f32.mrb[1].mxu0 }
  0xe1   :  { %v129_v39 = vadd.f32 %v481_v35, %v128_v38 }
  0xe2   :  { %v168_v42 = vmax.f32 %v134_v37, 0.0 }
  0xe3   :  { %v167_v40 = vmax.f32 %v129_v39, 0.0  ;;  %v565_v41 = vpop.f32.mrb[2].mxu0 }
  0xe4   :  { %v144_v43 = vadd.f32 %v565_v41, %v481_v35  ;;  %v138_v44 = vpop.f32.mrb[3].mxu0 }
  0xe5   :  { %v139_v45 = vadd.f32 %v481_v35, %v138_v44  ;;  %588 = vmatprep.mubr.msk.f32.mxu1 %vm188_vm1, %v167_v40 }
  0xe6   :  { %589 = vmatmul.mubr.msk.f32.vlgmr.msra.gmra.mrb[0].mxu1 %vm188_vm1, %v168_v42  ;;  %v170_v48 = vmax.f32 %v144_v43, 0.0 }
  0xe7   :  { %v169_v46 = vmax.f32 %v139_v45, 0.0  ;;  %v568_v47 = vpop.f32.mrb[4].mxu0  ;;  %672 = vmatpush3.bf16.msra.mxu1 %v652_v29 }
  0xe8   :  { %v154_v49 = vadd.f32 %v568_v47, %v481_v35  ;;  %v148_v50 = vpop.f32.mrb[5].mxu0  ;;  %669 = vmatprep.subr.bf16.mxu1 %v656_v31 }
  0xe9   :  { %v149_v51 = vadd.f32 %v481_v35, %v148_v50  ;;  %591 = vmatprep.mubr.msk.f32.mxu1 %vm188_vm1, %v169_v46 }
  0xea   :  { %592 = vmatmul.mubr.msk.f32.gmra.mrb[2].mxu1 %vm188_vm1, %v170_v48  ;;  %v172_v54 = vmax.f32 %v154_v49, 0.0 }
  0xeb   :  { %v171_v52 = vmax.f32 %v149_v51, 0.0  ;;  %v571_v53 = vpop.f32.mrb[6].mxu0  ;;  %673 = vmatpush3.bf16.msra.mxu1 %v656_v31 }
  0xec   :  { %v164_v55 = vadd.f32 %v571_v53, %v481_v35  ;;  %v158_v56 = vpop.f32.mrb[7].mxu0  ;;  %670 = vmatprep.subr.bf16.mxu1 %v660_v34 }
  0xed   :  { %v159_v57 = vadd.f32 %v481_v35, %v158_v56  ;;  %594 = vmatprep.mubr.msk.f32.mxu1 %vm188_vm1, %v171_v52 }
  0xee   :  { %595 = vmatmul.mubr.msk.f32.gmra.mrb[4].mxu1 %vm188_vm1, %v172_v54  ;;  %v174_v59 = vmax.f32 %v164_v55, 0.0 }
  0xef   :  { %v173_v58 = vmax.f32 %v159_v57, 0.0  ;;  %674 = vmatpush3.bf16.msra.mxu1 %v660_v34 }
  0xf0   :  { %671 = vmatprep.subr.bf16.mxu1 %v664_v62 }
  0xf1   :  { %597 = vmatprep.mubr.msk.f32.mxu1 %vm188_vm1, %v173_v58 }
  0xf2   :  { %598 = vmatmul.mubr.msk.f32.gmra.mrb[6].mxu1 %vm188_vm1, %v174_v59 }
  0xf3   :  { %675 = vmatpush3.bf16.msra.mxu1 %v664_v62 }
 0x1b9   :  { %v590_v0 = vpop.f32.mrb[0].mxu1 }
 0x1ba   :  { %v285_v1 = vadd.f32 %v590_v0, %v490_v63  ;;  %v279_v2 = vpop.f32.mrb[1].mxu1 }
 0x1bb   :  { %v280_v3 = vadd.f32 %v490_v63, %v279_v2 }
 0x1bc   :  { %v319_v6 = vmax.f32 %v285_v1, 0.0 }
 0x1bd   :  { %v318_v4 = vmax.f32 %v280_v3, 0.0  ;;  %v593_v5 = vpop.f32.mrb[2].mxu1 }
 0x1be   :  { %v295_v7 = vadd.f32 %v593_v5, %v490_v63  ;;  %v289_v8 = vpop.f32.mrb[3].mxu1 }
 0x1bf   :  { %v290_v9 = vadd.f32 %v490_v63, %v289_v8  ;;  %616 = vmatprep.mubr.msk.f32.mxu0 %vm188_vm1, %v318_v4 }
 0x1c0   :  { %617 = vmatmul.mubr.msk.f32.vlgmr.msra.gmra.mrb[8].mxu0 %vm188_vm1, %v319_v6  ;;  %v321_v12 = vmax.f32 %v295_v7, 0.0 }
 0x1c1   :  { %v320_v10 = vmax.f32 %v290_v9, 0.0  ;;  %v596_v11 = vpop.f32.mrb[4].mxu1 }
 0x1c2   :  { %v305_v13 = vadd.f32 %v596_v11, %v490_v63  ;;  %v299_v14 = vpop.f32.mrb[5].mxu1 }
 0x1c3   :  { %v300_v15 = vadd.f32 %v490_v63, %v299_v14  ;;  %619 = vmatprep.mubr.msk.f32.mxu0 %vm188_vm1, %v320_v10 }
 0x1c4   :  { %620 = vmatmul.mubr.msk.f32.gmra.mrb[10].mxu0 %vm188_vm1, %v321_v12  ;;  %v323_v18 = vmax.f32 %v305_v13, 0.0 }
 0x1c5   :  { %v322_v16 = vmax.f32 %v300_v15, 0.0  ;;  %v599_v17 = vpop.f32.mrb[6].mxu1 }
 0x1c6   :  { %v315_v19 = vadd.f32 %v599_v17, %v490_v63  ;;  %v309_v20 = vpop.f32.mrb[7].mxu1 }
 0x1c7   :  { %v310_v21 = vadd.f32 %v490_v63, %v309_v20  ;;  %622 = vmatprep.mubr.msk.f32.mxu0 %vm188_vm1, %v322_v16 }
 0x1c8   :  { %623 = vmatmul.mubr.msk.f32.gmra.mrb[12].mxu0 %vm188_vm1, %v323_v18  ;;  %v325_v23 = vmax.f32 %v315_v19, 0.0 }
 0x1c9   :  { %v324_v22 = vmax.f32 %v310_v21, 0.0 }
 0x1cb   :  { %625 = vmatprep.mubr.msk.f32.mxu1 %vm188_vm1, %v324_v22 }
 0x1cc   :  { %626 = vmatmul.mubr.msk.f32.vlgmr.msra.gmra.mrb[8].mxu1 %vm188_vm1, %v325_v23 }
 0x293   :  { %v618_v25 = vpop.f32.mrb[8].mxu0 }
 0x294   :  { %v435_v26 = vadd.f32 %v618_v25, %v499_v24  ;;  %v429_v27 = vpop.f32.mrb[9].mxu0 }
 0x295   :  { %v430_v28 = vadd.f32 %v499_v24, %v429_v27 }
 0x296   :  { %470 = vst.msk [vmem:[%s860_s5 + $0x8] sm:$0xff] %vm468_vm2, %v435_v26 }
 0x297   :  { %469 = vst.msk [vmem:[%s860_s5] sm:$0xff] %vm468_vm2, %v430_v28  ;;  %v621_v29 = vpop.f32.mrb[10].mxu0 }
 0x298   :  { %v445_v30 = vadd.f32 %v621_v29, %v499_v24  ;;  %v439_v31 = vpop.f32.mrb[11].mxu0 }
 0x299   :  { %v440_v32 = vadd.f32 %v499_v24, %v439_v31 }
 0x29a   :  { %472 = vst.msk [vmem:[%s860_s5 + $0x18] sm:$0xff] %vm468_vm2, %v445_v30 }
 0x29b   :  { %471 = vst.msk [vmem:[%s860_s5 + $0x10] sm:$0xff] %vm468_vm2, %v440_v32  ;;  %v624_v33 = vpop.f32.mrb[12].mxu0 }
 0x29c   :  { %v455_v34 = vadd.f32 %v624_v33, %v499_v24  ;;  %v449_v35 = vpop.f32.mrb[13].mxu0 }
 0x29d   :  { %v450_v36 = vadd.f32 %v499_v24, %v449_v35 }
 0x29e   :  { %474 = vst.msk [vmem:[%s860_s5 + $0x28] sm:$0xff] %vm468_vm2, %v455_v34 }
 0x29f   :  { %473 = vst.msk [vmem:[%s860_s5 + $0x20] sm:$0xff] %vm468_vm2, %v450_v36  ;;  %v627_v37 = vpop.f32.mrb[8].mxu1 }
 0x2a0   :  { %v465_v38 = vadd.f32 %v627_v37, %v499_v24  ;;  %v459_v39 = vpop.f32.mrb[9].mxu1 }
 0x2a1   :  { %v460_v40 = vadd.f32 %v499_v24, %v459_v39 }
 0x2a2   :  { %476 = vst.msk [vmem:[%s860_s5 + $0x38] sm:$0xff] %vm468_vm2, %v465_v38 }
 0x2a3   :  { %475 = vst.msk [vmem:[%s860_s5 + $0x30] sm:$0xff] %vm468_vm2, %v460_v40 }

</bundles_post_ra>
